<compile_context>
chip_gen: v7x
topology: tpu7x:2x2x1
jax: 0.10.0
libtpu: 0.0.40
codegen_flags: <defaults>
</compile_context>

<pallas_src>
import functools

import jax
import jax.numpy as jnp
import numpy as np
from jax import lax
from jax.experimental import pallas as pl
from jax.experimental.pallas import tpu as pltpu

BN_EPS = 1e-5
SUBNET = 3
GROUPS = 8
STATS_CORES = 2  # leading parallel axis for the stats pass (v7x has 2 TCs)


# ---------------------------------------------------------------------------
# Hardware-aware knobs
# ---------------------------------------------------------------------------
@functools.lru_cache(maxsize=1)
def _vmem_capacity_bytes():
    try:
        return int(pltpu.get_tpu_info().vmem_capacity_bytes)
    except Exception:
        return 0  # unknown -> conservative defaults below


def _vmem_limit_bytes():
    cap = _vmem_capacity_bytes()
    if cap <= 0:
        return 32 * 1024 * 1024
    return max(32 * 1024 * 1024, min((cap * 3) // 4, 96 * 1024 * 1024))


def _default_block_rows():
    cap = _vmem_capacity_bytes()
    return 2048 if cap >= 100 * 1024 * 1024 else 1024


def _compiler_params(semantics):
    return pltpu.CompilerParams(dimension_semantics=semantics,
                                vmem_limit_bytes=_vmem_limit_bytes())


def _round_up(x, k):
    return ((x + k - 1) // k) * k


def _choose_tiling(m, target, parallel):
    """Row-tile size (multiple of 8) and zero-padded row count."""
    tm = min(int(target), _round_up(m, 8))
    tm = _round_up(tm, 8)
    if m >= 64:  # enough rows: aim for >= ~4 grid steps in the main pass
        tm = min(tm, _round_up(pl.cdiv(m, 4), 8))
    tm = max(tm, 8)
    m_pad = _round_up(m, tm * parallel)
    return tm, m_pad


# ---------------------------------------------------------------------------
# Pallas kernels
# ---------------------------------------------------------------------------
def _stats_kernel(x_ref, csum_ref, gram_ref):
    """One pass over x: per-column sums and the Gram matrix G = x^T x.

    Zero-padded rows contribute nothing, so padding M up to the tile size is
    exact.  All three BatchNorms' batch statistics are derived analytically
    from (colsum, G) in plain JAX afterwards.
    """
    @pl.when(pl.program_id(1) == 0)
    def _():
        csum_ref[...] = jnp.zeros_like(csum_ref)
        gram_ref[...] = jnp.zeros_like(gram_ref)

    x = x_ref[...]                                                   # (TM, D)
    csum_ref[...] += jnp.sum(x, axis=0, keepdims=True)[None]         # (1,1,D)
    gram_ref[...] += lax.dot_general(
        x, x, (((0,), (0,)), ((), ())),
        preferred_element_type=jnp.float32)[None]                    # (1,D,D)


def _main_kernel(x_ref, w_ref, c_ref, o_ref):
    """Whole pipeline folded into one matmul: out = relu(x @ Wmain + cmain)."""
    y = jnp.dot(x_ref[...], w_ref[...], preferred_element_type=jnp.float32)
    o_ref[...] = jnp.maximum(y + c_ref[...], 0.0)


# ---------------------------------------------------------------------------
# pallas_call wrappers
# ---------------------------------------------------------------------------
def _stats_call(x_rows, tm, steps):
    _, d = x_rows.shape
    return pl.pallas_call(
        _stats_kernel,
        grid=(STATS_CORES, steps),
        in_specs=[pl.BlockSpec((tm, d), lambda p, i: (p * steps + i, 0))],
        out_specs=(pl.BlockSpec((1, 1, d), lambda p, i: (p, 0, 0)),
                   pl.BlockSpec((1, d, d), lambda p, i: (p, 0, 0))),
        out_shape=(jax.ShapeDtypeStruct((STATS_CORES, 1, d), jnp.float32),
                   jax.ShapeDtypeStruct((STATS_CORES, d, d), jnp.float32)),
        compiler_params=_compiler_params(("parallel", "arbitrary")),
    )(x_rows)


def _main_call(x_rows, w_main, c_main, tm):
    m_pad, din = x_rows.shape
    dout = w_main.shape[1]
    return pl.pallas_call(
        _main_kernel,
        grid=(m_pad // tm,),
        in_specs=[pl.BlockSpec((tm, din), lambda i: (i, 0)),
                  pl.BlockSpec((din, dout), lambda i: (0, 0)),
                  pl.BlockSpec((1, dout), lambda i: (0, 0))],
        out_specs=pl.BlockSpec((tm, dout), lambda i: (i, 0)),
        out_shape=jax.ShapeDtypeStruct((m_pad, dout), jnp.float32),
        compiler_params=_compiler_params(("parallel",)),
    )(x_rows, w_main, c_main)


# ---------------------------------------------------------------------------
# Parameter folding helpers (plain JAX, run once per call, tiny vs main pass)
# ---------------------------------------------------------------------------
HI = "highest"  # full-f32 precision for the tiny folding matmuls


def _block_diag_over_v(w, v):
    """(Cin, Cout) -> (V*Cin, V*Cout), block-diagonal over the vertex dim."""
    cin, cout = w.shape
    eye_v = jnp.eye(v, dtype=w.dtype)
    blk = eye_v[:, None, :, None] * w[None, :, None, :]          # (V,Cin,V,Cout)
    return blk.reshape(v * cin, v * cout)


def _bn_affine(sum_x, sum_x2, cnt, gamma, beta):
    """Batch-stat BN folded into per-channel scale/shift.

    Note: variance as E[x^2]-mean^2 (exact in f32 at these activation scales);
    a centered two-pass variance would need another pass over x.
    """
    mean = sum_x / cnt
    var = sum_x2 / cnt - mean * mean      # biased batch variance (BN training)
    scale = gamma * lax.rsqrt(var + BN_EPS)
    shift = beta - mean * scale
    return scale, shift


# ---------------------------------------------------------------------------
# Full forward
# ---------------------------------------------------------------------------
@functools.partial(jax.jit, static_argnames=("block_rows", "channels_last"))
def decoupling_gcn_forward(x, params, block_rows=None, channels_last=False):
    n, cin, t, v = x.shape
    lin_w = params["lin_w"]                      # (Cin, 3*C)
    lin_b = params["lin_b"]                      # (3*C,)
    kc = lin_w.shape[1]
    c = kc // SUBNET
    has_down = "down_w" in params

    # Adjacency normalization (parameter-only, tiny).
    learn_a = jnp.tile(params["decouple_A"], (1, c // GROUPS, 1, 1))   # (3,C,V,V)
    norm = jnp.sqrt(jnp.sum(learn_a * learn_a, axis=1, keepdims=True)) + 1e-4
    a_norm = learn_a / norm

    # Lane-dense row form: row = (n,t) pixel, column = vertex*Cin + ci.
    x_rows = jnp.transpose(x, (0, 2, 3, 1)).reshape(n * t, v * cin)
    x_rows = x_rows.astype(jnp.float32)
    m = n * t

    if block_rows is None:
        block_rows = _default_block_rows()
    tm, m_pad = _choose_tiling(m, block_rows, STATS_CORES)
    if m_pad != m:
        x_rows = jnp.pad(x_rows, ((0, m_pad - m), (0, 0)))   # zero rows: exact
    steps = m_pad // (tm * STATS_CORES)

    # ---- Pass 1: colsum(x) + Gram matrix, accumulated across row tiles ----
    csum_p, gram_p = _stats_call(x_rows, tm, steps)
    csum = jnp.sum(csum_p[:, 0, :], axis=0)                  # (V*Cin,)
    gram = jnp.sum(gram_p, axis=0)                           # (V*Cin, V*Cin)

    cnt = float(m * v)                                       # BN sample count
    csum_over_v = csum.reshape(v, cin).sum(axis=0)           # (Cin,)
    vidx = jnp.arange(v)
    gram_diag_v = gram.reshape(v, cin, v, cin)[vidx, :, vidx, :].sum(axis=0)

    def _dense_branch_stats(w, b):
        # y = x_v @ w + b per vertex; sums over (rows, vertices).
        u = jnp.dot(csum_over_v, w, precision=HI)                       # (Dout,)
        q = jnp.sum(w * jnp.dot(gram_diag_v, w, precision=HI), axis=0)  # (Dout,)
        return u + cnt * b, q + 2.0 * b * u + cnt * b * b

    # BN0 (3C channels, batch statistics).
    sy, sy2 = _dense_branch_stats(lin_w, lin_b)
    scale0, shift0 = _bn_affine(sy, sy2, cnt, params["bn0_g"], params["bn0_b"])

    # Fold linear + BN0 + graph conv into Wz (V*Cin, V*C), bias bz (V*C,).
    w1s = (lin_w * scale0[None, :]).reshape(cin, SUBNET, c)
    wz = jnp.einsum("ikc,kcvw->viwc", w1s, a_norm,
                    precision=HI).reshape(v * cin, v * c)
    beta0 = (lin_b * scale0 + shift0).reshape(SUBNET, c)
    bz = jnp.einsum("kc,kcvw->wc", beta0, a_norm, precision=HI).reshape(v * c)

    # BN after the graph conv (C channels), analytically from (csum, G).
    uz = jnp.dot(csum, wz, precision=HI)                                # (V*C,)
    qz = jnp.sum(wz * jnp.dot(gram, wz, precision=HI), axis=0)          # (V*C,)
    sz = (uz + m * bz).reshape(v, c).sum(axis=0)
    sz2 = (qz + 2.0 * bz * uz + m * bz * bz).reshape(v, c).sum(axis=0)
    scale1, shift1 = _bn_affine(sz, sz2, cnt, params["bn_g"], params["bn_b"])

    # Final fold: one weight / bias for the fused main kernel.
    s1_t = jnp.tile(scale1, v)
    w_main = wz * s1_t[None, :]
    c_main = bz * s1_t + jnp.tile(shift1, v)

    if has_down:
        sd_, sd2_ = _dense_branch_stats(params["down_w"], params["down_b"])
        scaled, shiftd = _bn_affine(sd_, sd2_, cnt,
                                    params["bnd_g"], params["bnd_b"])
        w_main = w_main + _block_diag_over_v(params["down_w"] * scaled[None, :], v)
        c_main = c_main + jnp.tile(params["down_b"] * scaled + shiftd, v)
    else:
        # identity residual (Cin == C): fold the "+ x" as an identity block.
        w_main = w_main + jnp.eye(v * cin, dtype=w_main.dtype)

    # ---- Pass 2: fused forward, one matmul per row tile --------------------
    out_rows = _main_call(x_rows, w_main.astype(jnp.float32),
                          c_main[None, :].astype(jnp.float32), tm)
    out_rows = out_rows[:m]                                   # drop pad rows
    out = out_rows.reshape(n, t, v, c)                        # (N, T, V, C)
    if channels_last:
        return out                                            # skip transpose
    return jnp.transpose(out, (0, 3, 1, 2))                   # (N, C, T, V)


# ---------------------------------------------------------------------------
# Pure-JAX reference (mirrors the PyTorch forward) + deterministic params
# ---------------------------------------------------------------------------
def _bn_train_ref(x, gamma, beta):
    mu = jnp.mean(x, axis=(0, 2, 3), keepdims=True)
    var = jnp.mean((x - mu) ** 2, axis=(0, 2, 3), keepdims=True)
    return (x - mu) * lax.rsqrt(var + BN_EPS) * gamma[None, :, None, None] \
        + beta[None, :, None, None]


def ref_forward(x, params):
    n, cin, t, v = x.shape
    lin_w = params["lin_w"]
    kc = lin_w.shape[1]
    c = kc // SUBNET
    learn_a = jnp.tile(params["decouple_A"], (1, c // GROUPS, 1, 1))
    norm = jnp.sqrt(jnp.sum(learn_a * learn_a, axis=1, keepdims=True)) + 1e-4
    a_norm = learn_a / norm

    y = jnp.einsum("nctw,cd->ndtw", x, lin_w, precision=HI) \
        + params["lin_b"][None, :, None, None]
    y = _bn_train_ref(y, params["bn0_g"], params["bn0_b"])
    y = y.reshape(n, SUBNET, c, t, v)
    z = jnp.einsum("nkctv,kcvw->nctw", y, a_norm, precision=HI)
    z = _bn_train_ref(z, params["bn_g"], params["bn_b"])
    if "down_w" in params:
        d = jnp.einsum("nctw,co->notw", x, params["down_w"], precision=HI) \
            + params["down_b"][None, :, None, None]
        d = _bn_train_ref(d, params["bnd_g"], params["bnd_b"])
    else:
        d = x
    return jnp.maximum(z + d, 0.0)


def make_params(in_ch, out_ch, v, key):
    ks = jax.random.split(key, 3)
    kc = SUBNET * out_ch
    p = {}
    p["decouple_A"] = jax.random.normal(ks[0], (SUBNET, GROUPS, v, v), jnp.float32)
    p["lin_w"] = jax.random.normal(ks[1], (in_ch, kc), jnp.float32) * np.sqrt(0.5 / kc)
    p["lin_b"] = 1e-6 + 0.01 * jnp.sin(jnp.arange(kc, dtype=jnp.float32))
    p["bn0_g"] = 1.0 + 0.1 * jnp.cos(jnp.arange(kc, dtype=jnp.float32))
    p["bn0_b"] = 0.05 * jnp.sin(jnp.arange(kc, dtype=jnp.float32))
    p["bn_g"] = 1.0 + 0.1 * jnp.sin(jnp.arange(out_ch, dtype=jnp.float32))
    p["bn_b"] = 0.05 * jnp.cos(jnp.arange(out_ch, dtype=jnp.float32))
    if in_ch != out_ch:
        p["down_w"] = jax.random.normal(ks[2], (in_ch, out_ch), jnp.float32) * np.sqrt(2.0 / out_ch)
        p["down_b"] = 0.02 * jnp.cos(jnp.arange(out_ch, dtype=jnp.float32))
        p["bnd_g"] = 1.0 + 0.1 * jnp.cos(jnp.arange(out_ch, dtype=jnp.float32))
        p["bnd_b"] = 0.03 * jnp.sin(jnp.arange(out_ch, dtype=jnp.float32))
    return p


if __name__ == "__main__":
    N, T, V = 2, 8, 19                   # 19 skeleton vertices (A is 3x19x19)
    key = jax.random.PRNGKey(0)
    k_x, k_p, k_x2, k_p2 = jax.random.split(key, 4)

    # --- Case 1: in_ch != out_ch -> down (1x1 conv + BN) residual ---------
    in_ch, out_ch = 4, 16                # out_ch multiple of groups=8
    x = jax.random.normal(k_x, (N, in_ch, T, V), jnp.float32)
    params = make_params(in_ch, out_ch, V, k_p)
    # block_rows=8 -> multi-tile grid at this toy size (exercises the
    # cross-tile Gram/colsum accumulation); production uses the default.
    out = decoupling_gcn_forward(x, params, block_rows=8)
    jax.block_until_ready(out)
    ref = ref_forward(x, params)
    assert out.shape == (N, out_ch, T, V)
    np.testing.assert_allclose(np.asarray(out), np.asarray(ref), rtol=1e-3, atol=1e-3)

    # --- Case 2: in_ch == out_ch -> identity residual (folded as +I) ------
    ch = 16
    x2 = jax.random.normal(k_x2, (N, ch, T, V), jnp.float32)
    params2 = make_params(ch, ch, V, k_p2)
    out2 = decoupling_gcn_forward(x2, params2)   # default tiling: exercises row padding
    jax.block_until_ready(out2)
    ref2 = ref_forward(x2, params2)
    assert out2.shape == (N, ch, T, V)
    np.testing.assert_allclose(np.asarray(out2), np.asarray(ref2), rtol=1e-3, atol=1e-3)

    print("KERNEL_OK")
</pallas_src>

<mosaic_0001>
module attributes {stable_mosaic.version = 11 : i64} {
  func.func @_stats_kernel(%arg0: i32, %arg1: i32, %arg2: memref<8x76xf32, #tpu.memory_space<vmem>>, %arg3: memref<1x1x76xf32, #tpu.memory_space<vmem>>, %arg4: memref<1x76x76xf32, #tpu.memory_space<vmem>>) attributes {dimension_semantics = [#tpu.dimension_semantics<parallel>, #tpu.dimension_semantics<arbitrary>], iteration_bounds = array<i64: 2, 1>, scalar_prefetch = 0 : i64, scratch_operands = 0 : i64, tpu.core_type = #tpu.core_type<tc>, window_params = [{transform_indices = @transform_0, window_bounds = array<i64: 8, 76>}, {transform_indices = @transform_1, window_bounds = array<i64: 1, 1, 76>}, {transform_indices = @transform_2, window_bounds = array<i64: 1, 76, 76>}]} {
    %c0_i32 = arith.constant 0 : i32
    %0 = arith.cmpi eq, %arg1, %c0_i32 : i32
    %1 = arith.extui %0 : i1 to i32
    %c0_i32_0 = arith.constant 0 : i32
    %2 = arith.cmpi ne, %1, %c0_i32_0 : i32
    scf.if %2 {
      %cst_15 = arith.constant 0.000000e+00 : f32
      %15 = vector.broadcast %cst_15 : f32 to vector<1x1x76xf32>
      %c0_16 = arith.constant 0 : index
      %c0_17 = arith.constant 0 : index
      %c0_18 = arith.constant 0 : index
      %16 = vector.load %arg3[%c0_16, %c0_17, %c0_18] : memref<1x1x76xf32, #tpu.memory_space<vmem>>, vector<1x1x76xf32>
      tpu.vector_store %arg3[%c0_16, %c0_17, %c0_18], %15 {strides = array<i32>} : memref<1x1x76xf32, #tpu.memory_space<vmem>>, vector<1x1x76xf32>,
      %cst_19 = arith.constant 0.000000e+00 : f32
      %17 = vector.broadcast %cst_19 : f32 to vector<1x76x76xf32>
      %c0_20 = arith.constant 0 : index
      %c0_21 = arith.constant 0 : index
      %c0_22 = arith.constant 0 : index
      %18 = vector.load %arg4[%c0_20, %c0_21, %c0_22] : memref<1x76x76xf32, #tpu.memory_space<vmem>>, vector<1x76x76xf32>
      tpu.vector_store %arg4[%c0_20, %c0_21, %c0_22], %17 {strides = array<i32>} : memref<1x76x76xf32, #tpu.memory_space<vmem>>, vector<1x76x76xf32>,
    } else {
    }
    %c0 = arith.constant 0 : index
    %c0_1 = arith.constant 0 : index
    %3 = vector.load %arg2[%c0, %c0_1] : memref<8x76xf32, #tpu.memory_space<vmem>>, vector<8x76xf32>
    %c0_2 = arith.constant 0 : index
    %c0_3 = arith.constant 0 : index
    %c0_4 = arith.constant 0 : index
    %4 = vector.load %arg3[%c0_2, %c0_3, %c0_4] : memref<1x1x76xf32, #tpu.memory_space<vmem>>, vector<1x1x76xf32>
    %cst = arith.constant dense<0.000000e+00> : vector<76xf32>
    %5 = vector.multi_reduction <add>, %3, %cst [0] : vector<8x76xf32> to vector<76xf32>
    %6 = vector.shape_cast %5 : vector<76xf32> to vector<1x76xf32>
    %7 = vector.shape_cast %6 : vector<1x76xf32> to vector<1x1x76xf32>
    %8 = arith.addf %4, %7 : vector<1x1x76xf32>
    %c0_5 = arith.constant 0 : index
    %c0_6 = arith.constant 0 : index
    %c0_7 = arith.constant 0 : index
    %9 = vector.load %arg3[%c0_5, %c0_6, %c0_7] : memref<1x1x76xf32, #tpu.memory_space<vmem>>, vector<1x1x76xf32>
    tpu.vector_store %arg3[%c0_5, %c0_6, %c0_7], %8 {strides = array<i32>} : memref<1x1x76xf32, #tpu.memory_space<vmem>>, vector<1x1x76xf32>,
    %c0_8 = arith.constant 0 : index
    %c0_9 = arith.constant 0 : index
    %c0_10 = arith.constant 0 : index
    %10 = vector.load %arg4[%c0_8, %c0_9, %c0_10] : memref<1x76x76xf32, #tpu.memory_space<vmem>>, vector<1x76x76xf32>
    %cst_11 = arith.constant dense<0.000000e+00> : vector<76x76xf32>
    %11 = tpu.matmul %3, %3, %cst_11 {dimension_numbers = #tpu.dot_dimension_numbers<[0], [0], [1], [1], [0, 1, 1, 1], [], []>} : vector<8x76xf32>, vector<8x76xf32>, vector<76x76xf32> -> vector<76x76xf32>
    %12 = vector.shape_cast %11 : vector<76x76xf32> to vector<1x76x76xf32>
    %13 = arith.addf %10, %12 : vector<1x76x76xf32>
    %c0_12 = arith.constant 0 : index
    %c0_13 = arith.constant 0 : index
    %c0_14 = arith.constant 0 : index
    %14 = vector.load %arg4[%c0_12, %c0_13, %c0_14] : memref<1x76x76xf32, #tpu.memory_space<vmem>>, vector<1x76x76xf32>
    tpu.vector_store %arg4[%c0_12, %c0_13, %c0_14], %13 {strides = array<i32>} : memref<1x76x76xf32, #tpu.memory_space<vmem>>, vector<1x76x76xf32>,
    return
  }
  func.func @transform_0(%arg0: i32, %arg1: i32) -> (i32, i32) {
    %c1_i32 = arith.constant 1 : i32
    %0 = arith.muli %arg0, %c1_i32 : i32
    %1 = arith.addi %0, %arg1 : i32
    %c0_i32 = arith.constant 0 : i32
    %c0_i32_0 = arith.constant 0 : i32
    return %1, %c0_i32 : i32, i32
  }
  func.func @transform_1(%arg0: i32, %arg1: i32) -> (i32, i32, i32) {
    %c0_i32 = arith.constant 0 : i32
    %c0_i32_0 = arith.constant 0 : i32
    %c0_i32_1 = arith.constant 0 : i32
    return %arg0, %c0_i32, %c0_i32_0 : i32, i32, i32
  }
  func.func @transform_2(%arg0: i32, %arg1: i32) -> (i32, i32, i32) {
    %c0_i32 = arith.constant 0 : i32
    %c0_i32_0 = arith.constant 0 : i32
    %c0_i32_1 = arith.constant 0 : i32
    return %arg0, %c0_i32, %c0_i32_0 : i32, i32, i32
  }
}

module attributes {stable_mosaic.version = 11 : i64} {
  func.func @_main_kernel(%arg0: i32, %arg1: memref<8x76xf32, #tpu.memory_space<vmem>>, %arg2: memref<76x304xf32, #tpu.memory_space<vmem>>, %arg3: memref<1x304xf32, #tpu.memory_space<vmem>>, %arg4: memref<8x304xf32, #tpu.memory_space<vmem>>) attributes {dimension_semantics = [#tpu.dimension_semantics<parallel>], iteration_bounds = array<i64: 2>, scalar_prefetch = 0 : i64, scratch_operands = 0 : i64, tpu.core_type = #tpu.core_type<tc>, window_params = [{transform_indices = @transform_0, window_bounds = array<i64: 8, 76>}, {pipeline_mode = #tpu.pipeline_mode<synchronous>, transform_indices = @transform_1, window_bounds = array<i64: 76, 304>}, {pipeline_mode = #tpu.pipeline_mode<synchronous>, transform_indices = @transform_2, window_bounds = array<i64: 1, 304>}, {transform_indices = @transform_3, window_bounds = array<i64: 8, 304>}]} {
    %c0 = arith.constant 0 : index
    %c0_0 = arith.constant 0 : index
    %0 = vector.load %arg1[%c0, %c0_0] : memref<8x76xf32, #tpu.memory_space<vmem>>, vector<8x76xf32>
    %c0_1 = arith.constant 0 : index
    %c0_2 = arith.constant 0 : index
    %1 = vector.load %arg2[%c0_1, %c0_2] : memref<76x304xf32, #tpu.memory_space<vmem>>, vector<76x304xf32>
    %cst = arith.constant dense<0.000000e+00> : vector<8x304xf32>
    %2 = tpu.matmul %0, %1, %cst {dimension_numbers = #tpu.dot_dimension_numbers<[1], [0], [0], [1], [0, 0, 1, 1], [], []>} : vector<8x76xf32>, vector<76x304xf32>, vector<8x304xf32> -> vector<8x304xf32>
    %c0_3 = arith.constant 0 : index
    %c0_4 = arith.constant 0 : index
    %3 = vector.load %arg3[%c0_3, %c0_4] : memref<1x304xf32, #tpu.memory_space<vmem>>, vector<1x304xf32>
    %4 = vector.broadcast %3 : vector<1x304xf32> to vector<8x304xf32>
    %5 = arith.addf %2, %4 : vector<8x304xf32>
    %cst_5 = arith.constant 0.000000e+00 : f32
    %6 = vector.broadcast %cst_5 : f32 to vector<8x304xf32>
    %7 = arith.maximumf %5, %6 : vector<8x304xf32>
    %c0_6 = arith.constant 0 : index
    %c0_7 = arith.constant 0 : index
    %8 = vector.load %arg4[%c0_6, %c0_7] : memref<8x304xf32, #tpu.memory_space<vmem>>, vector<8x304xf32>
    tpu.vector_store %arg4[%c0_6, %c0_7], %7 {strides = array<i32>} : memref<8x304xf32, #tpu.memory_space<vmem>>, vector<8x304xf32>,
    return
  }
  func.func @transform_0(%arg0: i32) -> (i32, i32) {
    %c0_i32 = arith.constant 0 : i32
    %c0_i32_0 = arith.constant 0 : i32
    return %arg0, %c0_i32 : i32, i32
  }
  func.func @transform_1(%arg0: i32) -> (i32, i32) {
    %c0_i32 = arith.constant 0 : i32
    %c0_i32_0 = arith.constant 0 : i32
    %c0_i32_1 = arith.constant 0 : i32
    return %c0_i32, %c0_i32_0 : i32, i32
  }
  func.func @transform_2(%arg0: i32) -> (i32, i32) {
    %c0_i32 = arith.constant 0 : i32
    %c0_i32_0 = arith.constant 0 : i32
    %c0_i32_1 = arith.constant 0 : i32
    return %c0_i32, %c0_i32_0 : i32, i32
  }
  func.func @transform_3(%arg0: i32) -> (i32, i32) {
    %c0_i32 = arith.constant 0 : i32
    %c0_i32_0 = arith.constant 0 : i32
    return %arg0, %c0_i32 : i32, i32
  }
}

</mosaic_0001>

<bundles_post_ra>
// kernel: decoupling_gcn_forward.2
= control target key start
LH: loop header
LB: loop body
LE: loop exit
PB: predicated region body
PF: predicated region fallthrough
CT: control target
= control target key end

     0   :  { %s612_s9 = smov 0   ;;  %s614_s10 = smov 0   ;;  %s718_s0 = inlined_call_operand.vmem [shape: f32[16,76], index: 0, kind: input, shape index: {}]   ;;  %s719_s1 = inlined_call_operand.vmem [shape: f32[2,1,76], index: 1, kind: output, shape index: {0}]   ;;  %s720_s2 = inlined_call_operand.vmem [shape: f32[2,76,76], index: 2, kind: output, shape index: {1}]  }
   0x1   :  { %s616_s11 = smov 0  }
   0x2 LB: > { %s25_s12 = sadd.s32 1, %s590_s10  ;;  %p501_p0 = scmp.ge.s32.totalorder %s594_s11, 1  ;;  %s594_s11 = sphi %s616_s11, %s13_s11   ;;  %s590_s10 = sphi %s614_s10, %s722_s10   ;;  %s586_s9 = sphi %s612_s9, %s721_s9  }
   0x3   : > { %p27_p1 = scmp.ge.s32.totalorder %s25_s12, 2  ;;  %p130_p2 = scmp.lt.s32.totalorder %s594_s11, 3 }
   0x5   : > { %s724_s12 = smov (%p27_p1, %s25_s12), 0  ;;  %p131_p3 = pnand %p501_p0, %p130_p2 }
   0x6   : > { %p156_p4 = scmp.lt.s32.totalorder (!%p131_p3), %s586_s9, 1  ;;  %vm173_vm0 = vcmask (!%p131_p3), 614400   ;;  %v596_v0 = vmov (!%p131_p3), 0.0   ;;  %vm175_vm1 = vcmask (!%p131_p3), 621568   ;;  %vm242_vm2 = vcmask (!%p131_p3), 64512  }
   0x7   : > { %134 = sbr.rel (%p131_p3) target bundleno = 399 (0x18f), region = 24  ;;  %vm185_vm3 = vcmask (!%p131_p3), 617472  }
   0xe   : > { %s726_s9 = smov (!%p156_p4, %s586_s9), 1 }
   0xf   : > { %s502_s13 = sshll.u32 %s726_s9, 3  ;;  %s633_s16 = scalar_lea.vmem %s719_s1, %s726_s9 }
  0x10   : > { %s159_s19 = scalar_lea.vmem %s718_s0, %s502_s13  ;;  %s546_s20 = smul.u32 80, %s726_s9  ;;  %174 = vst.msk [vmem:[%s633_s16] sm:$0x1] %vm173_vm0, %v596_v0 }
  0x11   : > { %v187_v1 = vld [vmem:[%s159_s19] sm:$0xff] }
  0x12   : > { %s643_s23 = scalar_lea.vmem %s720_s2, %s546_s20  ;;  %210 = vxpose.xlu0.b32.start.end [1/1] (short) (narrow) %v187_v1, 80  ;;  %v190_v2 = vsel %vm175_vm1, %v187_v1, 0.0  ;;  %527 = vmatprep.subr.mxu0 %v187_v1 }
  0x13   : > { %v191_v3 = vrot.slane %v190_v2, 4  ;;  %176 = vst.msk [vmem:[%s643_s23] sm:$0xff] %vm175_vm1, %v596_v0  ;;  %177 = vst.msk [vmem:[%s643_s23 + $0x8] sm:$0xff] %vm175_vm1, %v596_v0  ;;  %528 = vmatpush3.msra.mxu0 %v187_v1  ;;  %544 = vmatprep.subr.mxu1 %v187_v1 }
  0x14   : > { %178 = vst.msk [vmem:[%s643_s23 + $0x10] sm:$0xff] %vm175_vm1, %v596_v0  ;;  %179 = vst.msk [vmem:[%s643_s23 + $0x18] sm:$0xff] %vm175_vm1, %v596_v0  ;;  %545 = vmatpush3.msra.mxu1 %v187_v1 }
  0x15   : > { %180 = vst.msk [vmem:[%s643_s23 + $0x20] sm:$0xff] %vm175_vm1, %v596_v0  ;;  %181 = vst.msk [vmem:[%s643_s23 + $0x28] sm:$0xff] %vm175_vm1, %v596_v0  ;;  %v192_v4 = vadd.f32 %v191_v3, %v190_v2 }
  0x16   : > { %182 = vst.msk [vmem:[%s643_s23 + $0x30] sm:$0xff] %vm175_vm1, %v596_v0  ;;  %183 = vst.msk [vmem:[%s643_s23 + $0x38] sm:$0xff] %vm175_vm1, %v596_v0 }
  0x17   : > { %184 = vst.msk [vmem:[%s643_s23 + $0x40] sm:$0xff] %vm175_vm1, %v596_v0  ;;  %v193_v5 = vrot.slane %v192_v4, 2  ;;  %v188_v8 = vld [vmem:[%s633_s16] sm:$0x1] }
  0x18   : > { %186 = vst.msk [vmem:[%s643_s23 + $0x48] sm:$0xf] %vm185_vm3, %v596_v0 }
  0x19   : > { %v194_v6 = vadd.f32 %v193_v5, %v192_v4 }
  0x1a   : > { %v201_v21 = vld [vmem:[%s643_s23 + $0x8] sm:$0xff]  ;;  %v200_v22 = vld [vmem:[%s643_s23] sm:$0xff] }
  0x1b   : > { %v195_v7 = vrot.slane %v194_v6, 1  ;;  %v203_v27 = vld [vmem:[%s643_s23 + $0x18] sm:$0xff]  ;;  %v202_v28 = vld [vmem:[%s643_s23 + $0x10] sm:$0xff] }
  0x1c   : > { %v205_v33 = vld [vmem:[%s643_s23 + $0x28] sm:$0xff]  ;;  %v204_v34 = vld [vmem:[%s643_s23 + $0x20] sm:$0xff] }
  0x1d   : > { %v196_v9 = vadd.f32 %v195_v7, %v194_v6  ;;  %v207_v39 = vld [vmem:[%s643_s23 + $0x38] sm:$0xff]  ;;  %v206_v40 = vld [vmem:[%s643_s23 + $0x30] sm:$0xff] }
  0x1e   : > { %v208_v46 = vld [vmem:[%s643_s23 + $0x40] sm:$0xff] }
  0x1f   : > { %v197_v10 = vadd.f32 %v196_v9, %v188_v8  ;;  %v209_v45 = vld [vmem:[%s643_s23 + $0x48] sm:$0xf] }
  0x21   : > { %199 = vst.msk [vmem:[%s633_s16] sm:$0x1] %vm173_vm0, %v197_v10 }
  0x92   : > { %v226_v11 = vpop.trf.xlu0 }
  0x93   : > { %529 = vmatprep.mubr.msk.f32.mxu0 %vm242_vm2, %v226_v11 }
  0x96   : > { %v227_v12 = vpop.trf.xlu0 }
  0x97   : > { %530 = vmatmul.mubr.msk.f32.vlgmr.msra.gmra.mrb[0].mxu0 %vm242_vm2, %v227_v12 }
  0x9a   : > { %v228_v13 = vpop.trf.xlu0 }
  0x9b   : > { %532 = vmatprep.mubr.msk.f32.mxu0 %vm242_vm2, %v228_v13 }
  0x9e   : > { %v229_v14 = vpop.trf.xlu0 }
  0x9f   : > { %533 = vmatmul.mubr.msk.f32.gmra.mrb[2].mxu0 %vm242_vm2, %v229_v14 }
  0xa2   : > { %v230_v15 = vpop.trf.xlu0 }
  0xa3   : > { %535 = vmatprep.mubr.msk.f32.mxu0 %vm242_vm2, %v230_v15 }
  0xa6   : > { %v231_v16 = vpop.trf.xlu0 }
  0xa7   : > { %536 = vmatmul.mubr.msk.f32.gmra.mrb[4].mxu0 %vm242_vm2, %v231_v16 }
  0xaa   : > { %v232_v17 = vpop.trf.xlu0 }
  0xab   : > { %538 = vmatprep.mubr.msk.f32.mxu1 %vm242_vm2, %v232_v17 }
  0xae   : > { %v233_v18 = vpop.trf.xlu0 }
  0xaf   : > { %539 = vmatmul.mubr.msk.f32.vlgmr.msra.gmra.mrb[0].mxu1 %vm242_vm2, %v233_v18 }
  0xb2   : > { %v234_v19 = vpop.trf.xlu0 }
  0xb3   : > { %541 = vmatprep.mubr.msk.f32.mxu1 %vm242_vm2, %v234_v19 }
  0xb6   : > { %v235_v20 = vpop.trf.xlu0 }
  0xb7   : > { %542 = vmatmul.mubr.msk.f32.gmra.mrb[2].mxu1 %vm242_vm2, %v235_v20 }
 0x16a   : > { %v531_v23 = vpop.f32.mrb[0].mxu0 }
 0x16b   : > { %v389_v24 = vadd.f32 %v531_v23, %v201_v21  ;;  %v339_v25 = vpop.f32.mrb[1].mxu0 }
 0x16c   : > { %v388_v26 = vadd.f32 %v339_v25, %v200_v22 }
 0x16d   : > { %399 = vst.msk [vmem:[%s643_s23 + $0x8] sm:$0xff] %vm175_vm1, %v389_v24 }
 0x16e   : > { %398 = vst.msk [vmem:[%s643_s23] sm:$0xff] %vm175_vm1, %v388_v26 }
 0x172   : > { %v534_v29 = vpop.f32.mrb[2].mxu0 }
 0x173   : > { %v391_v30 = vadd.f32 %v534_v29, %v203_v27  ;;  %v349_v31 = vpop.f32.mrb[3].mxu0 }
 0x174   : > { %v390_v32 = vadd.f32 %v349_v31, %v202_v28 }
 0x175   : > { %401 = vst.msk [vmem:[%s643_s23 + $0x18] sm:$0xff] %vm175_vm1, %v391_v30 }
 0x176   : > { %400 = vst.msk [vmem:[%s643_s23 + $0x10] sm:$0xff] %vm175_vm1, %v390_v32 }
 0x17a   : > { %v537_v35 = vpop.f32.mrb[4].mxu0 }
 0x17b   : > { %v393_v36 = vadd.f32 %v537_v35, %v205_v33  ;;  %v359_v37 = vpop.f32.mrb[5].mxu0 }
 0x17c   : > { %v392_v38 = vadd.f32 %v359_v37, %v204_v34 }
 0x17d   : > { %403 = vst.msk [vmem:[%s643_s23 + $0x28] sm:$0xff] %vm175_vm1, %v393_v36 }
 0x17e   : > { %402 = vst.msk [vmem:[%s643_s23 + $0x20] sm:$0xff] %vm175_vm1, %v392_v38 }
 0x182   : > { %v540_v41 = vpop.f32.mrb[0].mxu1 }
 0x183   : > { %v395_v42 = vadd.f32 %v540_v41, %v207_v39  ;;  %v369_v43 = vpop.f32.mrb[1].mxu1 }
 0x184   : > { %v394_v44 = vadd.f32 %v369_v43, %v206_v40 }
 0x185   : > { %405 = vst.msk [vmem:[%s643_s23 + $0x38] sm:$0xff] %vm175_vm1, %v395_v42 }
 0x186   : > { %404 = vst.msk [vmem:[%s643_s23 + $0x30] sm:$0xff] %vm175_vm1, %v394_v44 }
 0x18a   : > { %v543_v47 = vpop.f32.mrb[2].mxu1 }
 0x18b   : > { %v397_v48 = vadd.f32 %v543_v47, %v209_v45  ;;  %v379_v49 = vpop.f32.mrb[3].mxu1 }
 0x18c   : > { %v396_v50 = vadd.f32 %v379_v49, %v208_v46 }
 0x18d   : > { %408 = vst.msk [vmem:[%s643_s23 + $0x48] sm:$0xf] %vm185_vm3, %v397_v48 }
 0x18e   : > { %406 = vst.msk [vmem:[%s643_s23 + $0x40] sm:$0xff] %vm175_vm1, %v396_v50 }
 0x18f PF: > { %s13_s11 = sadd.s32 1, %s594_s11   ;;  %s721_s9 = smov %s590_s10 }
 0x190   : > { %p10_p5 = scmp.ge.s32.totalorder %s13_s11, 4   ;;  %s722_s10 = smov %s724_s12 }
 0x192   :  { %12 = sbr.rel (!%p10_p5) target bundleno = 2 (0x2), region = 70 }

// kernel: mul.8
= control target key start
LH: loop header
LB: loop body
LE: loop exit
PB: predicated region body
PF: predicated region fallthrough
CT: control target
= control target key end

     0   :  { %s1266_s0 = inlined_call_operand.vmem [shape: f32[3,8,19,19], index: 0, kind: input, shape index: {}, may-alias: {0,1}]   ;;  %s1267_s1 = inlined_call_operand.vmem [shape: f32[3,8,19,19], index: 1, kind: input, shape index: {}, may-alias: {0,1}]   ;;  %s1268_s2 = inlined_call_operand.vmem [shape: f32[3,8,19,19], index: 2, kind: output, shape index: {}]  }
   0x1   :  { %v3_v0 = vld [vmem:[%s1266_s0] sm:$0xff]  ;;  %v570_v2 = vld [vmem:[%s1266_s0 + $0x98] sm:$0xff]  ;;  %v573_v5 = vld [vmem:[%s1266_s0 + $0x130] sm:$0xff] }
   0x2   :  { %v4_v1 = vld [vmem:[%s1267_s1] sm:$0xff]  ;;  %v571_v4 = vld [vmem:[%s1267_s1 + $0x98] sm:$0xff]  ;;  %v574_v6 = vld [vmem:[%s1267_s1 + $0x130] sm:$0xff] }
   0x3   :  { %v7_v3 = vmul.f32 %v4_v1, %v3_v0  ;;  %v16_v7 = vmul.f32 %v571_v4, %v570_v2  ;;  %v26_v8 = vmul.f32 %v574_v6, %v573_v5  ;;  %v576_v9 = vld [vmem:[%s1266_s0 + $0x8] sm:$0xff]  ;;  %v579_v11 = vld [vmem:[%s1266_s0 + $0xa0] sm:$0xff]  ;;  %v582_v14 = vld [vmem:[%s1266_s0 + $0x138] sm:$0xff] }
   0x4   :  { %v577_v10 = vld [vmem:[%s1267_s1 + $0x8] sm:$0xff]  ;;  %v580_v13 = vld [vmem:[%s1267_s1 + $0xa0] sm:$0xff]  ;;  %v583_v15 = vld [vmem:[%s1267_s1 + $0x138] sm:$0xff] }
   0x5   :  { %9 = vst [vmem:[%s1268_s2] sm:$0xff] %v7_v3  ;;  %v36_v12 = vmul.f32 %v577_v10, %v576_v9  ;;  %572 = vst [vmem:[%s1268_s2 + $0x98] sm:$0xff] %v16_v7  ;;  %v46_v16 = vmul.f32 %v580_v13, %v579_v11  ;;  %v56_v17 = vmul.f32 %v583_v15, %v582_v14  ;;  %v585_v18 = vld [vmem:[%s1266_s0 + $0x10] sm:$0xff]  ;;  %v588_v20 = vld [vmem:[%s1266_s0 + $0xa8] sm:$0xff] }
   0x6   :  { %575 = vst [vmem:[%s1268_s2 + $0x130] sm:$0xff] %v26_v8  ;;  %v586_v19 = vld [vmem:[%s1267_s1 + $0x10] sm:$0xff]  ;;  %v589_v22 = vld [vmem:[%s1267_s1 + $0xa8] sm:$0xff]  ;;  %v591_v23 = vld [vmem:[%s1266_s0 + $0x140] sm:$0xff] }
   0x7   :  { %578 = vst [vmem:[%s1268_s2 + $0x8] sm:$0xff] %v36_v12  ;;  %v66_v21 = vmul.f32 %v586_v19, %v585_v18  ;;  %v592_v24 = vld [vmem:[%s1267_s1 + $0x140] sm:$0xff]  ;;  %581 = vst [vmem:[%s1268_s2 + $0xa0] sm:$0xff] %v46_v16  ;;  %v76_v25 = vmul.f32 %v589_v22, %v588_v20  ;;  %v594_v27 = vld [vmem:[%s1266_s0 + $0x18] sm:$0xff] }
   0x8   :  { %584 = vst [vmem:[%s1268_s2 + $0x138] sm:$0xff] %v56_v17  ;;  %v86_v26 = vmul.f32 %v592_v24, %v591_v23  ;;  %v595_v28 = vld [vmem:[%s1267_s1 + $0x18] sm:$0xff]  ;;  %v597_v29 = vld [vmem:[%s1266_s0 + $0xb0] sm:$0xff]  ;;  %v600_v32 = vld [vmem:[%s1266_s0 + $0x148] sm:$0xff] }
   0x9   :  { %587 = vst [vmem:[%s1268_s2 + $0x10] sm:$0xff] %v66_v21  ;;  %v96_v30 = vmul.f32 %v595_v28, %v594_v27  ;;  %v598_v31 = vld [vmem:[%s1267_s1 + $0xb0] sm:$0xff]  ;;  %v601_v33 = vld [vmem:[%s1267_s1 + $0x148] sm:$0xff]  ;;  %590 = vst [vmem:[%s1268_s2 + $0xa8] sm:$0xff] %v76_v25 }
   0xa   :  { %593 = vst [vmem:[%s1268_s2 + $0x140] sm:$0xff] %v86_v26  ;;  %v106_v34 = vmul.f32 %v598_v31, %v597_v29  ;;  %v116_v35 = vmul.f32 %v601_v33, %v600_v32  ;;  %v603_v36 = vld [vmem:[%s1266_s0 + $0x20] sm:$0xff]  ;;  %v606_v38 = vld [vmem:[%s1266_s0 + $0xb8] sm:$0xff]  ;;  %v609_v41 = vld [vmem:[%s1266_s0 + $0x150] sm:$0xff] }
   0xb   :  { %v604_v37 = vld [vmem:[%s1267_s1 + $0x20] sm:$0xff]  ;;  %596 = vst [vmem:[%s1268_s2 + $0x18] sm:$0xff] %v96_v30  ;;  %v607_v40 = vld [vmem:[%s1267_s1 + $0xb8] sm:$0xff]  ;;  %v610_v42 = vld [vmem:[%s1267_s1 + $0x150] sm:$0xff] }
   0xc   :  { %v126_v39 = vmul.f32 %v604_v37, %v603_v36  ;;  %599 = vst [vmem:[%s1268_s2 + $0xb0] sm:$0xff] %v106_v34  ;;  %602 = vst [vmem:[%s1268_s2 + $0x148] sm:$0xff] %v116_v35  ;;  %v136_v43 = vmul.f32 %v607_v40, %v606_v38  ;;  %v146_v44 = vmul.f32 %v610_v42, %v609_v41  ;;  %v612_v45 = vld [vmem:[%s1266_s0 + $0x28] sm:$0xff]  ;;  %v615_v47 = vld [vmem:[%s1266_s0 + $0xc0] sm:$0xff] }
   0xd   :  { %v613_v46 = vld [vmem:[%s1267_s1 + $0x28] sm:$0xff]  ;;  %v616_v49 = vld [vmem:[%s1267_s1 + $0xc0] sm:$0xff]  ;;  %v618_v50 = vld [vmem:[%s1266_s0 + $0x158] sm:$0xff] }
   0xe   :  { %605 = vst [vmem:[%s1268_s2 + $0x20] sm:$0xff] %v126_v39  ;;  %v156_v48 = vmul.f32 %v613_v46, %v612_v45  ;;  %v619_v51 = vld [vmem:[%s1267_s1 + $0x158] sm:$0xff]  ;;  %608 = vst [vmem:[%s1268_s2 + $0xb8] sm:$0xff] %v136_v43  ;;  %v166_v52 = vmul.f32 %v616_v49, %v615_v47  ;;  %v621_v54 = vld [vmem:[%s1266_s0 + $0x30] sm:$0xff] }
   0xf   :  { %611 = vst [vmem:[%s1268_s2 + $0x150] sm:$0xff] %v146_v44  ;;  %v176_v53 = vmul.f32 %v619_v51, %v618_v50  ;;  %v622_v55 = vld [vmem:[%s1267_s1 + $0x30] sm:$0xff]  ;;  %v624_v56 = vld [vmem:[%s1266_s0 + $0xc8] sm:$0xff]  ;;  %v627_v59 = vld [vmem:[%s1266_s0 + $0x160] sm:$0xff] }
  0x10   :  { %614 = vst [vmem:[%s1268_s2 + $0x28] sm:$0xff] %v156_v48  ;;  %v186_v57 = vmul.f32 %v622_v55, %v621_v54  ;;  %v625_v58 = vld [vmem:[%s1267_s1 + $0xc8] sm:$0xff]  ;;  %v628_v60 = vld [vmem:[%s1267_s1 + $0x160] sm:$0xff]  ;;  %617 = vst [vmem:[%s1268_s2 + $0xc0] sm:$0xff] %v166_v52 }
  0x11   :  { %620 = vst [vmem:[%s1268_s2 + $0x158] sm:$0xff] %v176_v53  ;;  %v196_v61 = vmul.f32 %v625_v58, %v624_v56  ;;  %v206_v62 = vmul.f32 %v628_v60, %v627_v59  ;;  %v630_v63 = vld [vmem:[%s1266_s0 + $0x38] sm:$0xff]  ;;  %v633_v1 = vld [vmem:[%s1266_s0 + $0xd0] sm:$0xff]  ;;  %v636_v4 = vld [vmem:[%s1266_s0 + $0x168] sm:$0xff] }
  0x12   :  { %v631_v0 = vld [vmem:[%s1267_s1 + $0x38] sm:$0xff]  ;;  %623 = vst [vmem:[%s1268_s2 + $0x30] sm:$0xff] %v186_v57  ;;  %v634_v3 = vld [vmem:[%s1267_s1 + $0xd0] sm:$0xff]  ;;  %v637_v5 = vld [vmem:[%s1267_s1 + $0x168] sm:$0xff] }
  0x13   :  { %v216_v2 = vmul.f32 %v631_v0, %v630_v63  ;;  %626 = vst [vmem:[%s1268_s2 + $0xc8] sm:$0xff] %v196_v61  ;;  %629 = vst [vmem:[%s1268_s2 + $0x160] sm:$0xff] %v206_v62  ;;  %v226_v6 = vmul.f32 %v634_v3, %v633_v1  ;;  %v236_v7 = vmul.f32 %v637_v5, %v636_v4  ;;  %v639_v8 = vld [vmem:[%s1266_s0 + $0x40] sm:$0xff]  ;;  %v642_v10 = vld [vmem:[%s1266_s0 + $0xd8] sm:$0xff] }
  0x14   :  { %v640_v9 = vld [vmem:[%s1267_s1 + $0x40] sm:$0xff]  ;;  %v643_v12 = vld [vmem:[%s1267_s1 + $0xd8] sm:$0xff]  ;;  %v645_v13 = vld [vmem:[%s1266_s0 + $0x170] sm:$0xff] }
  0x15   :  { %632 = vst [vmem:[%s1268_s2 + $0x38] sm:$0xff] %v216_v2  ;;  %v246_v11 = vmul.f32 %v640_v9, %v639_v8  ;;  %v646_v14 = vld [vmem:[%s1267_s1 + $0x170] sm:$0xff]  ;;  %635 = vst [vmem:[%s1268_s2 + $0xd0] sm:$0xff] %v226_v6  ;;  %v256_v15 = vmul.f32 %v643_v12, %v642_v10  ;;  %v648_v17 = vld [vmem:[%s1266_s0 + $0x48] sm:$0xff] }
  0x16   :  { %638 = vst [vmem:[%s1268_s2 + $0x168] sm:$0xff] %v236_v7  ;;  %v266_v16 = vmul.f32 %v646_v14, %v645_v13  ;;  %v649_v18 = vld [vmem:[%s1267_s1 + $0x48] sm:$0xff]  ;;  %v651_v19 = vld [vmem:[%s1266_s0 + $0xe0] sm:$0xff]  ;;  %v654_v22 = vld [vmem:[%s1266_s0 + $0x178] sm:$0xff] }
  0x17   :  { %641 = vst [vmem:[%s1268_s2 + $0x40] sm:$0xff] %v246_v11  ;;  %v276_v20 = vmul.f32 %v649_v18, %v648_v17  ;;  %v652_v21 = vld [vmem:[%s1267_s1 + $0xe0] sm:$0xff]  ;;  %v655_v23 = vld [vmem:[%s1267_s1 + $0x178] sm:$0xff]  ;;  %644 = vst [vmem:[%s1268_s2 + $0xd8] sm:$0xff] %v256_v15 }
  0x18   :  { %647 = vst [vmem:[%s1268_s2 + $0x170] sm:$0xff] %v266_v16  ;;  %v286_v24 = vmul.f32 %v652_v21, %v651_v19  ;;  %v296_v25 = vmul.f32 %v655_v23, %v654_v22  ;;  %v657_v26 = vld [vmem:[%s1266_s0 + $0x50] sm:$0xff]  ;;  %v660_v28 = vld [vmem:[%s1266_s0 + $0xe8] sm:$0xff]  ;;  %v663_v31 = vld [vmem:[%s1266_s0 + $0x180] sm:$0xff] }
  0x19   :  { %v658_v27 = vld [vmem:[%s1267_s1 + $0x50] sm:$0xff]  ;;  %650 = vst [vmem:[%s1268_s2 + $0x48] sm:$0xff] %v276_v20  ;;  %v661_v30 = vld [vmem:[%s1267_s1 + $0xe8] sm:$0xff]  ;;  %v664_v32 = vld [vmem:[%s1267_s1 + $0x180] sm:$0xff] }
  0x1a   :  { %v306_v29 = vmul.f32 %v658_v27, %v657_v26  ;;  %653 = vst [vmem:[%s1268_s2 + $0xe0] sm:$0xff] %v286_v24  ;;  %656 = vst [vmem:[%s1268_s2 + $0x178] sm:$0xff] %v296_v25  ;;  %v316_v33 = vmul.f32 %v661_v30, %v660_v28  ;;  %v326_v34 = vmul.f32 %v664_v32, %v663_v31  ;;  %v666_v35 = vld [vmem:[%s1266_s0 + $0x58] sm:$0xff]  ;;  %v669_v37 = vld [vmem:[%s1266_s0 + $0xf0] sm:$0xff] }
  0x1b   :  { %v667_v36 = vld [vmem:[%s1267_s1 + $0x58] sm:$0xff]  ;;  %v670_v39 = vld [vmem:[%s1267_s1 + $0xf0] sm:$0xff]  ;;  %v672_v40 = vld [vmem:[%s1266_s0 + $0x188] sm:$0xff] }
  0x1c   :  { %659 = vst [vmem:[%s1268_s2 + $0x50] sm:$0xff] %v306_v29  ;;  %v336_v38 = vmul.f32 %v667_v36, %v666_v35  ;;  %v673_v41 = vld [vmem:[%s1267_s1 + $0x188] sm:$0xff]  ;;  %662 = vst [vmem:[%s1268_s2 + $0xe8] sm:$0xff] %v316_v33  ;;  %v346_v42 = vmul.f32 %v670_v39, %v669_v37  ;;  %v675_v44 = vld [vmem:[%s1266_s0 + $0x60] sm:$0xff] }
  0x1d   :  { %665 = vst [vmem:[%s1268_s2 + $0x180] sm:$0xff] %v326_v34  ;;  %v356_v43 = vmul.f32 %v673_v41, %v672_v40  ;;  %v676_v45 = vld [vmem:[%s1267_s1 + $0x60] sm:$0xff]  ;;  %v678_v46 = vld [vmem:[%s1266_s0 + $0xf8] sm:$0xff]  ;;  %v681_v49 = vld [vmem:[%s1266_s0 + $0x190] sm:$0xff] }
  0x1e   :  { %668 = vst [vmem:[%s1268_s2 + $0x58] sm:$0xff] %v336_v38  ;;  %v366_v47 = vmul.f32 %v676_v45, %v675_v44  ;;  %v679_v48 = vld [vmem:[%s1267_s1 + $0xf8] sm:$0xff]  ;;  %v682_v50 = vld [vmem:[%s1267_s1 + $0x190] sm:$0xff]  ;;  %671 = vst [vmem:[%s1268_s2 + $0xf0] sm:$0xff] %v346_v42 }
  0x1f   :  { %674 = vst [vmem:[%s1268_s2 + $0x188] sm:$0xff] %v356_v43  ;;  %v376_v51 = vmul.f32 %v679_v48, %v678_v46  ;;  %v386_v52 = vmul.f32 %v682_v50, %v681_v49  ;;  %v684_v53 = vld [vmem:[%s1266_s0 + $0x68] sm:$0xff]  ;;  %v687_v55 = vld [vmem:[%s1266_s0 + $0x100] sm:$0xff]  ;;  %v690_v58 = vld [vmem:[%s1266_s0 + $0x198] sm:$0xff] }
  0x20   :  { %v685_v54 = vld [vmem:[%s1267_s1 + $0x68] sm:$0xff]  ;;  %677 = vst [vmem:[%s1268_s2 + $0x60] sm:$0xff] %v366_v47  ;;  %v688_v57 = vld [vmem:[%s1267_s1 + $0x100] sm:$0xff]  ;;  %v691_v59 = vld [vmem:[%s1267_s1 + $0x198] sm:$0xff] }
  0x21   :  { %v396_v56 = vmul.f32 %v685_v54, %v684_v53  ;;  %680 = vst [vmem:[%s1268_s2 + $0xf8] sm:$0xff] %v376_v51  ;;  %683 = vst [vmem:[%s1268_s2 + $0x190] sm:$0xff] %v386_v52  ;;  %v406_v60 = vmul.f32 %v688_v57, %v687_v55  ;;  %v416_v61 = vmul.f32 %v691_v59, %v690_v58  ;;  %v693_v62 = vld [vmem:[%s1266_s0 + $0x70] sm:$0xff]  ;;  %v696_v0 = vld [vmem:[%s1266_s0 + $0x108] sm:$0xff] }
  0x22   :  { %v694_v63 = vld [vmem:[%s1267_s1 + $0x70] sm:$0xff]  ;;  %v697_v2 = vld [vmem:[%s1267_s1 + $0x108] sm:$0xff]  ;;  %v699_v3 = vld [vmem:[%s1266_s0 + $0x1a0] sm:$0xff] }
  0x23   :  { %686 = vst [vmem:[%s1268_s2 + $0x68] sm:$0xff] %v396_v56  ;;  %v426_v1 = vmul.f32 %v694_v63, %v693_v62  ;;  %v700_v4 = vld [vmem:[%s1267_s1 + $0x1a0] sm:$0xff]  ;;  %689 = vst [vmem:[%s1268_s2 + $0x100] sm:$0xff] %v406_v60  ;;  %v436_v5 = vmul.f32 %v697_v2, %v696_v0  ;;  %v702_v7 = vld [vmem:[%s1266_s0 + $0x78] sm:$0xff] }
  0x24   :  { %692 = vst [vmem:[%s1268_s2 + $0x198] sm:$0xff] %v416_v61  ;;  %v446_v6 = vmul.f32 %v700_v4, %v699_v3  ;;  %v703_v8 = vld [vmem:[%s1267_s1 + $0x78] sm:$0xff]  ;;  %v705_v9 = vld [vmem:[%s1266_s0 + $0x110] sm:$0xff]  ;;  %v708_v12 = vld [vmem:[%s1266_s0 + $0x1a8] sm:$0xff] }
  0x25   :  { %695 = vst [vmem:[%s1268_s2 + $0x70] sm:$0xff] %v426_v1  ;;  %v456_v10 = vmul.f32 %v703_v8, %v702_v7  ;;  %v706_v11 = vld [vmem:[%s1267_s1 + $0x110] sm:$0xff]  ;;  %v709_v13 = vld [vmem:[%s1267_s1 + $0x1a8] sm:$0xff]  ;;  %698 = vst [vmem:[%s1268_s2 + $0x108] sm:$0xff] %v436_v5 }
  0x26   :  { %701 = vst [vmem:[%s1268_s2 + $0x1a0] sm:$0xff] %v446_v6  ;;  %v466_v14 = vmul.f32 %v706_v11, %v705_v9  ;;  %v476_v15 = vmul.f32 %v709_v13, %v708_v12  ;;  %v711_v16 = vld [vmem:[%s1266_s0 + $0x80] sm:$0xff]  ;;  %v714_v18 = vld [vmem:[%s1266_s0 + $0x118] sm:$0xff]  ;;  %v717_v21 = vld [vmem:[%s1266_s0 + $0x1b0] sm:$0xff] }
  0x27   :  { %v712_v17 = vld [vmem:[%s1267_s1 + $0x80] sm:$0xff]  ;;  %704 = vst [vmem:[%s1268_s2 + $0x78] sm:$0xff] %v456_v10  ;;  %v715_v20 = vld [vmem:[%s1267_s1 + $0x118] sm:$0xff]  ;;  %v718_v22 = vld [vmem:[%s1267_s1 + $0x1b0] sm:$0xff] }
  0x28   :  { %v486_v19 = vmul.f32 %v712_v17, %v711_v16  ;;  %707 = vst [vmem:[%s1268_s2 + $0x110] sm:$0xff] %v466_v14  ;;  %710 = vst [vmem:[%s1268_s2 + $0x1a8] sm:$0xff] %v476_v15  ;;  %v496_v23 = vmul.f32 %v715_v20, %v714_v18  ;;  %v506_v24 = vmul.f32 %v718_v22, %v717_v21  ;;  %v720_v25 = vld [vmem:[%s1266_s0 + $0x88] sm:$0xff]  ;;  %v723_v27 = vld [vmem:[%s1266_s0 + $0x120] sm:$0xff] }
  0x29   :  { %v721_v26 = vld [vmem:[%s1267_s1 + $0x88] sm:$0xff]  ;;  %v724_v29 = vld [vmem:[%s1267_s1 + $0x120] sm:$0xff]  ;;  %v726_v30 = vld [vmem:[%s1266_s0 + $0x1b8] sm:$0xff] }
  0x2a   :  { %713 = vst [vmem:[%s1268_s2 + $0x80] sm:$0xff] %v486_v19  ;;  %v516_v28 = vmul.f32 %v721_v26, %v720_v25  ;;  %v727_v31 = vld [vmem:[%s1267_s1 + $0x1b8] sm:$0xff]  ;;  %716 = vst [vmem:[%s1268_s2 + $0x118] sm:$0xff] %v496_v23  ;;  %v526_v32 = vmul.f32 %v724_v29, %v723_v27  ;;  %v729_v34 = vld [vmem:[%s1266_s0 + $0x90] sm:$0xff] }
  0x2b   :  { %719 = vst [vmem:[%s1268_s2 + $0x1b0] sm:$0xff] %v506_v24  ;;  %v536_v33 = vmul.f32 %v727_v31, %v726_v30  ;;  %v730_v35 = vld [vmem:[%s1267_s1 + $0x90] sm:$0xff]  ;;  %v732_v36 = vld [vmem:[%s1266_s0 + $0x128] sm:$0xff]  ;;  %v735_v39 = vld [vmem:[%s1266_s0 + $0x1c0] sm:$0xff] }
  0x2c   :  { %722 = vst [vmem:[%s1268_s2 + $0x88] sm:$0xff] %v516_v28  ;;  %v546_v37 = vmul.f32 %v730_v35, %v729_v34  ;;  %v733_v38 = vld [vmem:[%s1267_s1 + $0x128] sm:$0xff]  ;;  %v736_v40 = vld [vmem:[%s1267_s1 + $0x1c0] sm:$0xff]  ;;  %725 = vst [vmem:[%s1268_s2 + $0x120] sm:$0xff] %v526_v32 }
  0x2d   :  { %728 = vst [vmem:[%s1268_s2 + $0x1b8] sm:$0xff] %v536_v33  ;;  %v556_v41 = vmul.f32 %v733_v38, %v732_v36  ;;  %v566_v42 = vmul.f32 %v736_v40, %v735_v39 }
  0x2e   :  { %731 = vst [vmem:[%s1268_s2 + $0x90] sm:$0xff] %v546_v37 }
  0x2f   :  { %734 = vst [vmem:[%s1268_s2 + $0x128] sm:$0xff] %v556_v41  ;;  %737 = vst [vmem:[%s1268_s2 + $0x1c0] sm:$0xff] %v566_v42 }

// kernel: tile.29.clone
= control target key start
LH: loop header
LB: loop body
LE: loop exit
PB: predicated region body
PF: predicated region fallthrough
CT: control target
= control target key end

     0   :  { %s34_s0 = inlined_call_operand.vmem [shape: f32[16], index: 0, kind: input, shape index: {}]   ;;  %s35_s1 = inlined_call_operand.vmem [shape: f32[19,16], index: 1, kind: output, shape index: {}]  }
   0x1   :  { %v4_v0 = vld [vmem:[%s34_s0] ss:$0 sm:$0xff] }
   0x2   :  { %5 = vst [vmem:[%s35_s1] sm:$0xff] %v4_v0  ;;  %10 = vst [vmem:[%s35_s1 + $0x8] sm:$0xff] %v4_v0 }
   0x3   :  { %11 = vst [vmem:[%s35_s1 + $0x10] sm:$0xff] %v4_v0 }

// kernel: mul.79
= control target key start
LH: loop header
LB: loop body
LE: loop exit
PB: predicated region body
PF: predicated region fallthrough
CT: control target
= control target key end

     0   :  { %s6_s6 = smov 3  ;;  %s20_s9 = smov 3  ;;  %vm3_vm0 = vcmask 130048   ;;  %vm10_vm1 = vcmask 1048448   ;;  %vm17_vm2 = vcmask 917248   ;;  %vm24_vm3 = vcmask 786048   ;;  %s116_s0 = inlined_call_operand.vmem [shape: f32[19,16], index: 0, kind: input, shape index: {}]   ;;  %s117_s1 = inlined_call_operand.vmem [shape: f32[304], index: 1, kind: output, shape index: {}]  }
   0x1   :  { %v58_v0 = vld [vmem:[%s116_s0 + $0x7] ss:$8 sm:%s6_s6]   ;;  %s72_s10 = smov 112   ;;  %v60_v1 = vld [vmem:[%s116_s0 + $0x5] ss:$8 sm:%s20_s9]   ;;  %s13_s13 = smov 3 }
   0x2   :  { %8 = vrot.lane.b32.xlu0 %v58_v0, %s72_s10  ;;  %s73_s14 = smov 80   ;;  %v59_v2 = vld [vmem:[%s116_s0 + $0x6] ss:$8 sm:%s13_s13]   ;;  %s27_s17 = smov 3  ;;  %vm31_vm4 = vcmask 654848   ;;  %vm38_vm5 = vcmask 523648  }
   0x3   :  { %22 = vrot.lane.b32.xlu1 %v60_v1, %s73_s14  ;;  %v61_v3 = vld [vmem:[%s116_s0 + $0x4] ss:$8 sm:%s27_s17]   ;;  %s34_s20 = smov 3  ;;  %s74_s21 = smov 96   ;;  %vm44_vm6 = vcmask 392448   ;;  %vm50_vm7 = vcmask 261248  }
   0x4   :  { %v2_v4 = vld [vmem:[%s116_s0] ss:$8 sm:$0x7]   ;;  %s75_s24 = smov 64   ;;  %v62_v5 = vld [vmem:[%s116_s0 + $0x3] ss:$8 sm:%s34_s20]  }
   0x5   :  { %4 = vst.msk [vmem:[#allocation0] sm:$0x7] %vm3_vm0, %v2_v4   ;;  %v63_v6 = vld [vmem:[%s116_s0 + $0x2] ss:$8 sm:$0x7]   ;;  %s76_s29 = smov 48  }
   0x6   :  { %15 = vrot.lane.b32.xlu0 %v59_v2, %s74_s21  ;;  %s77_s30 = smov 32   ;;  %v64_v7 = vld [vmem:[%s116_s0 + $0x1] ss:$8 sm:$0x7]   ;;  %s78_s0 = smov 16  }
   0x7   :  { %29 = vrot.lane.b32.xlu1 %v61_v3, %s75_s24 }
   0xa   :  { %36 = vrot.lane.b32.xlu0 %v62_v5, %s76_s29 }
   0xb   :  { %42 = vrot.lane.b32.xlu1 %v63_v6, %s77_s30 }
   0xe   :  { %48 = vrot.lane.b32.xlu0 %v64_v7, %s78_s0 }
  0x74   :  { %v9_v8 = vpop.permute.xlu0 %8  }
  0x75   :  { %11 = vst.msk [vmem:[#allocation0] sm:$0x3] %vm10_vm1, %v9_v8   ;;  %v23_v9 = vpop.permute.xlu1 %22  }
  0x78   :  { %v16_v10 = vpop.permute.xlu0 %15  }
  0x79   :  { %18 = vst.msk [vmem:[#allocation0] sm:$0x3] %vm17_vm2, %v16_v10   ;;  %v30_v11 = vpop.permute.xlu1 %29  }
  0x7a   :  { %25 = vst.msk [vmem:[#allocation0] sm:$0x3] %vm24_vm3, %v23_v9  }
  0x7b   :  { %32 = vst.msk [vmem:[#allocation0] sm:$0x3] %vm31_vm4, %v30_v11  }
  0x7c   :  { %v37_v12 = vpop.permute.xlu0 %36  }
  0x7d   :  { %39 = vst.msk [vmem:[#allocation0] sm:$0x3] %vm38_vm5, %v37_v12   ;;  %v43_v13 = vpop.permute.xlu1 %42  }
  0x7e   :  { %45 = vst.msk [vmem:[#allocation0] sm:$0x7] %vm44_vm6, %v43_v13  }
  0x80   :  { %v49_v14 = vpop.permute.xlu0 %48  }
  0x81   :  { %51 = vst.msk [vmem:[#allocation0] sm:$0x7] %vm50_vm7, %v49_v14  }
  0x88   :  { %v55_v15 = vld [vmem:[#allocation0] sm:$0xf] }
  0x89   :  { %57 = vst [vmem:[%s117_s1] sm:$0xf] %v55_v15 }

// kernel: decoupling_gcn_forward.3
= control target key start
LH: loop header
LB: loop body
LE: loop exit
PB: predicated region body
PF: predicated region fallthrough
CT: control target
= control target key end

     0   :  { %s564_s12 = smov 0   ;;  %s693_s0 = inlined_call_operand.vmem [shape: f32[16,76], index: 0, kind: input, shape index: {}]   ;;  %s694_s1 = inlined_call_operand.vmem [shape: f32[76,304], index: 1, kind: input, shape index: {}]   ;;  %s695_s2 = inlined_call_operand.vmem [shape: f32[1,304], index: 2, kind: input, shape index: {}]   ;;  %s696_s3 = inlined_call_operand.vmem [shape: f32[16,304], index: 3, kind: output, shape index: {}]  }
   0x1 LB: > { %s433_s13 = sadd.s32 4294967295, %s538_s12   ;;  %p437_p0 = scmp.ge.s32.totalorder %s538_s12, 1  ;;  %s538_s12 = sphi %s564_s12, %s13_s12  }
   0x2   : > { %p136_p1 = scmp.lt.s32.totalorder %s538_s12, 3 }
   0x4   : > { %p137_p2 = pnand %p437_p0, %p136_p1 }
   0x5   : > { %v170_v0 = vld [vmem:[%s694_s1 + $0x8] sm:$0xff] (!%p137_p2)  ;;  %v173_v1 = vld [vmem:[%s694_s1 + $0x20] sm:$0xff] (!%p137_p2)  ;;  %v540_v4 = vmov (!%p137_p2), 0.0|0.0   ;;  %v172_v5 = vld [vmem:[%s694_s1 + $0x18] sm:$0xff] (!%p137_p2)  ;;  %v541_v13 = vmov (!%p137_p2), 0.0   ;;  %vm542_vm0 = vmmov (!%p137_p2), 0   ;;  %v201_v48 = vlaneseq (!%p137_p2) }
   0x6   : > { %140 = sbr.rel (%p137_p2) target bundleno = 246 (0xf6), region = 32  ;;  %v169_v2 = vld [vmem:[%s694_s1] sm:$0xff] (!%p137_p2)  ;;  %v481_v3 = vpack.c.bf16 (!%p137_p2), %v173_v1, %v170_v0  ;;  %503 = vmatprep.subr.bf16.mxu1 (!%p137_p2), %v540_v4  ;;  %v171_v6 = vld [vmem:[%s694_s1 + $0x10] sm:$0xff] (!%p137_p2)  ;;  %v174_v7 = vld [vmem:[%s694_s1 + $0x28] sm:$0xff] (!%p137_p2)  ;;  %294 = vmatprep.mubr.f32.mxu0 (!%p137_p2), %v541_v13  ;;  %p636_p3 = scmp.lt.s32.totalorder (!%p137_p2), %s433_s13, 1  ;;  %vm220_vm1 = vcmask (!%p137_p2), 1043456  }
   0x7   : > { %v483_v8 = vpack.c.bf16 (!%p137_p2), %v172_v5, %v169_v2  ;;  %v504_v9 = vpack.c.bf16 (!%p137_p2), %v174_v7, %v171_v6  ;;  %v176_v10 = vld [vmem:[%s694_s1 + $0x38] sm:$0xff] (!%p137_p2)  ;;  %v179_v11 = vld [vmem:[%s694_s1 + $0x50] sm:$0xff] (!%p137_p2)  ;;  %478 = vmatprep.mubr.msk.f32.mxu1 (!%p137_p2), %vm542_vm0, %v541_v13  ;;  %v178_v15 = vld [vmem:[%s694_s1 + $0x48] sm:$0xff] (!%p137_p2)  ;;  %vm543_vm2 = vmmov (!%p137_p2), 1   ;;  %vm216_vm4 = vcmask (!%p137_p2), 621568  }
   0x8   : > { %v175_v12 = vld [vmem:[%s694_s1 + $0x30] sm:$0xff] (!%p137_p2)  ;;  %482 = vmatprep.subr.bf16.mxu0 (!%p137_p2), %v481_v3  ;;  %v485_v14 = vpack.c.bf16 (!%p137_p2), %v179_v11, %v176_v10  ;;  %v177_v16 = vld [vmem:[%s694_s1 + $0x40] sm:$0xff] (!%p137_p2)  ;;  %v180_v17 = vld [vmem:[%s694_s1 + $0x58] sm:$0xff] (!%p137_p2)  ;;  %v202_v49 = vshrl.u32 (!%p137_p2), %v201_v48, 7  ;;  %vm376_vm5 = vcmask (!%p137_p2), 392192  }
   0x9   : > { %484 = vmatpush1.bf16.msra.mxu0 (!%p137_p2), %v483_v8  ;;  %505 = vmatpush3.bf16.msra.mxu1 (!%p137_p2), %v504_v9  ;;  %v487_v18 = vpack.c.bf16 (!%p137_p2), %v178_v15, %v175_v12  ;;  %v507_v19 = vpack.c.bf16 (!%p137_p2), %v180_v17, %v177_v16  ;;  %v182_v20 = vld [vmem:[%s694_s1 + $0x68] sm:$0xff] (!%p137_p2)  ;;  %v185_v21 = vld [vmem:[%s694_s1 + $0x80] sm:$0xff] (!%p137_p2)  ;;  %v184_v24 = vld [vmem:[%s694_s1 + $0x78] sm:$0xff] (!%p137_p2) }
   0xa   : > { %v181_v22 = vld [vmem:[%s694_s1 + $0x60] sm:$0xff] (!%p137_p2)  ;;  %486 = vmatprep.subr.bf16.mxu0 (!%p137_p2), %v485_v14  ;;  %506 = vmatprep.subr.bf16.mxu1 (!%p137_p2), %v540_v4  ;;  %v489_v23 = vpack.c.bf16 (!%p137_p2), %v185_v21, %v182_v20  ;;  %v183_v25 = vld [vmem:[%s694_s1 + $0x70] sm:$0xff] (!%p137_p2)  ;;  %v186_v26 = vld [vmem:[%s694_s1 + $0x88] sm:$0xff] (!%p137_p2)  ;;  %v203_v50 = vsub.s32 (!%p137_p2), 0, %v202_v49  ;;  %v211_v51 = vsub.s32 (!%p137_p2), 2, %v202_v49  ;;  %v207_v53 = vsub.s32 (!%p137_p2), 1, %v202_v49 }
   0xb   : > { %v188_v27 = vld [vmem:[%s694_s1 + $0x98] sm:$0xff] (!%p137_p2)  ;;  %v191_v28 = vld [vmem:[%s694_s1 + $0xb0] sm:$0xff] (!%p137_p2)  ;;  %v491_v29 = vpack.c.bf16 (!%p137_p2), %v184_v24, %v181_v22  ;;  %v510_v30 = vpack.c.bf16 (!%p137_p2), %v186_v26, %v183_v25  ;;  %v190_v33 = vld [vmem:[%s694_s1 + $0xa8] sm:$0xff] (!%p137_p2) }
   0xc   : > { %v187_v31 = vld [vmem:[%s694_s1 + $0x90] sm:$0xff] (!%p137_p2)  ;;  %v493_v32 = vpack.c.bf16 (!%p137_p2), %v191_v28, %v188_v27  ;;  %v189_v34 = vld [vmem:[%s694_s1 + $0xa0] sm:$0xff] (!%p137_p2)  ;;  %v192_v35 = vld [vmem:[%s694_s1 + $0xb8] sm:$0xff] (!%p137_p2) }
   0xd   : > { %488 = vmatpush1.bf16.msra.mxu0 %v487_v18  ;;  %508 = vmatpush3.bf16.msra.mxu1 %v507_v19  ;;  %v194_v36 = vld [vmem:[%s694_s1 + $0xc8] sm:$0xff]  ;;  %v197_v37 = vld [vmem:[%s694_s1 + $0xe0] sm:$0xf]  ;;  %s699_s13 = smov (!%p636_p3, %s433_s13), 1  ;;  %v495_v38 = vpack.c.bf16 %v190_v33, %v187_v31  ;;  %v513_v39 = vpack.c.bf16 %v192_v35, %v189_v34  ;;  %v196_v42 = vld [vmem:[%s694_s1 + $0xd8] sm:$0xf] }
   0xe   : > { %490 = vmatprep.subr.bf16.mxu0 %v489_v23  ;;  %509 = vmatprep.subr.bf16.mxu1 %v540_v4  ;;  %v193_v40 = vld [vmem:[%s694_s1 + $0xc0] sm:$0xff]  ;;  %v497_v41 = vpack.c.bf16 %v197_v37, %v194_v36  ;;  %v195_v43 = vld [vmem:[%s694_s1 + $0xd0] sm:$0xff]  ;;  %v198_v44 = vld [vmem:[%s694_s1 + $0xe8] sm:$0xf]  ;;  %s438_s25 = sshll.u32 %s699_s13, 3  ;;  %s519_s4 = smul.u32 24, %s699_s13 }
   0xf   : > { %vm498_vm3 = vmpackc.low %vm220_vm1, %vm543_vm2  ;;  %v500_v45 = vpack.c.bf16 %v196_v42, %v193_v40  ;;  %v516_v46 = vpack.c.bf16 %v198_v44, %v195_v43  ;;  %s162_s28 = scalar_lea.vmem %s693_s0, %s438_s25  ;;  %v199_v52 = vld [vmem:[%s695_s2] sm:$0x7] }
  0x10   : > { %v168_v47 = vld [vmem:[%s162_s28] sm:$0xff]  ;;  %v204_v54 = vrot.slane %v199_v52, %v203_v50  ;;  %v212_v55 = vrot.slane %v199_v52, %v211_v51  ;;  %v208_v56 = vrot.slane %v199_v52, %v207_v53  ;;  %s167_s7 = scalar_lea.vmem %s696_s3, %s519_s4 }
  0x11   : > { %492 = vmatpush1.bf16.msra.mxu0 %v491_v29  ;;  %511 = vmatpush3.bf16.msra.mxu1 %v510_v30 }
  0x12   : > { %494 = vmatprep.subr.bf16.mxu0 %v493_v32  ;;  %512 = vmatprep.subr.bf16.mxu1 %v540_v4 }
  0x15   : > { %496 = vmatpush1.bf16.msra.mxu0 %v495_v38  ;;  %514 = vmatpush3.bf16.msra.mxu1 %v513_v39 }
  0x16   : > { %499 = vmatprep.subr.msk.bf16.mxu0 %vm498_vm3, %v497_v41  ;;  %515 = vmatprep.subr.bf16.mxu1 %v540_v4 }
  0x19   : > { %502 = vmatpush1.bf16.msk.msra.mxu0 %vm498_vm3, %v500_v45  ;;  %518 = vmatpush3.bf16.msk.msra.mxu1 %vm498_vm3, %v516_v46 }
  0x1c   : > { %442 = vmatmul.mubr.msk.f32.vlgmr.msra.gmra.mrb[0].mxu0 %vm216_vm4, %v168_v47  ;;  %479 = vmatmul.mubr.msk.f32.vlgmr.msra.gmra.mrb[0].mxu1 %vm216_vm4, %v168_v47 }
  0xef   : > { %v296_v57 = vpop.f32.mrb[0].mxu0  ;;  %v367_v58 = vpop.f32.mrb[0].mxu1 }
  0xf0   : > { %v297_v59 = vadd.f32 %v296_v57, %v204_v54  ;;  %v368_v60 = vadd.f32 %v367_v58, %v212_v55  ;;  %v298_v61 = vpop.f32.mrb[1].mxu0  ;;  %v480_v62 = vpop.f32.mrb[1].mxu1 }
  0xf1   : > { %v299_v63 = vadd.f32 %v298_v61, %v208_v56 }
  0xf2   : > { %v371_v0 = vmax.f32 %v297_v59, 0.0  ;;  %v373_v1 = vmax.f32 %v368_v60, 0.0 }
  0xf3   : > { %v372_v2 = vmax.f32 %v299_v63, 0.0 }
  0xf4   : > { %374 = vst [vmem:[%s167_s7] sm:$0xff] %v371_v0  ;;  %377 = vst.msk [vmem:[%s167_s7 + $0x10] sm:$0xff] %vm376_vm5, %v373_v1 }
  0xf5   : > { %375 = vst [vmem:[%s167_s7 + $0x8] sm:$0xff] %v372_v2 }
  0xf6 PF: > { %s13_s12 = sadd.s32 1, %s538_s12  }
  0xf7   : > { %p10_p4 = scmp.ge.s32.totalorder %s13_s12, 4  }
  0xf9   :  { %12 = sbr.rel (!%p10_p4) target bundleno = 1 (0x1), region = 62 }

</bundles_post_ra>
